<compile_context>
chip_gen: v7x
topology: tpu7x:2x2x1
jax: 0.10.0
libtpu: 0.0.40
codegen_flags: <defaults>
</compile_context>

<pallas_src>
import functools
import math

import jax
import jax.numpy as jnp
from jax.experimental import pallas as pl
from jax.experimental.pallas import tpu as pltpu


def _round_up(x, m):
    return ((x + m - 1) // m) * m


def _vmem_budget_bytes():
    """(tile budget, scoped vmem limit) derived from the local TPU generation."""
    try:
        cap = int(pltpu.get_tpu_info().vmem_capacity_bytes)
    except Exception:
        cap = 64 * 1024 * 1024  # conservative fallback (v7x per-core VMEM)
    cap = max(cap, 16 * 1024 * 1024)
    # ~40% of physical VMEM for double-buffered blocks + scratch, limit at ~70%.
    return (2 * cap) // 5, (7 * cap) // 10


def _pick_tiles(batch, i, j, itemsize, budget_bytes):
    """Largest (tq, tj) whose double-buffered in/out blocks + scratch fit the budget."""
    tq = min(_round_up(i, 8), 256)          # query tile, multiple of 8 (sublanes)
    tj = min(_round_up(j, 128), 2048)       # key tile, multiple of 128 (lanes)

    def need(tq_, tj_):
        blk = batch * tq_ * tj_ * itemsize                  # one (B,1,tq,tj) buffer
        return 4 * blk + 13 * tq_ * tj_ * 4                 # 2x in + 2x out + scratch/temps

    while need(tq, tj) > budget_bytes:
        if tj > 512:
            tj = max(128, (tj // 2) // 128 * 128)
        elif tq > 8:
            tq = max(8, (tq // 2) // 8 * 8)
        elif tj > 128:
            tj = max(128, (tj // 2) // 128 * 128)
        else:
            break
    return tq, tj


def _t5_bias_kernel(emb_ref, qk_ref, o_ref, bucket_ref, *, scale, causal,
                    num_buckets, max_distance, seq_i, seq_j, tq, tj):
    # emb_ref   : SMEM [H, num_buckets] (head-major for scalar reads)
    # qk_ref/o_ref: VMEM [B, 1, tq, tj] tile (one head, one (q,k) tile)
    # bucket_ref: VMEM [tq, tj] int32 scratch, persists across the head loop
    qt = pl.program_id(0)
    kt = pl.program_id(1)
    h = pl.program_id(2)          # innermost ("arbitrary") -> bucket cache is valid

    @pl.when(h == 0)
    def _():
        # Head-independent bucket math: compute once per (q,k) tile.
        row0 = qt * tq
        col0 = kt * tj
        r = jax.lax.broadcasted_iota(jnp.int32, (tq, tj), 0) + row0
        c = jax.lax.broadcasted_iota(jnp.int32, (tq, tj), 1) + col0
        n = (seq_j - seq_i) + r - c           # n = q_pos - k_pos = -(rel_pos)
        if causal:
            nb = num_buckets
            base = jnp.zeros_like(n)
            n = jnp.maximum(n, 0)
        else:
            nb = num_buckets // 2
            base = (n < 0).astype(jnp.int32) * nb
            n = jnp.abs(n)
        max_exact = nb // 2
        is_small = n < max_exact
        n_f = jnp.maximum(n.astype(jnp.float32), 1.0)
        # log(n/max_exact)/log(max_distance/max_exact)*(nb-max_exact) folded:
        # one EUP log, no per-element divide (trunc-toward-zero == torch .long()).
        mult = float(nb - max_exact) / math.log(max_distance / max_exact)
        val_large = max_exact + (
            jnp.log(n_f * (1.0 / max_exact)) * mult).astype(jnp.int32)
        val_large = jnp.minimum(val_large, nb - 1)
        bucket_ref[...] = base + jnp.where(is_small, n, val_large)

    bucket = bucket_ref[...]                   # (tq, tj) int32 in [0, num_buckets)

    # Gather emb[:, h] at `bucket`: select chain over the small SMEM table.
    # Computed once per (head, tile) and broadcast over batch in the add below,
    # so the VALU cost amortizes by B.  Scale is folded into the scalar reads.
    bias = jnp.zeros((tq, tj), jnp.float32)
    for b in range(num_buckets):
        bias = jnp.where(bucket == b, emb_ref[h, b] * scale, bias)

    # One cast per (tq, tj) tile; the per-element add stays in the qk dtype
    # (native bf16 add on v6e/v7x when qk_dots is bf16).
    o_ref[...] = qk_ref[...] + bias.astype(o_ref.dtype)[None, None, :, :]


def t5_relative_position_bias(qk_dots, rel_emb, *, scale, causal=False,
                              num_buckets=32, max_distance=128):
    """Fused `qk_dots + T5 relative-position bias * scale`.

    qk_dots: [B, H, i, j]; rel_emb: [num_buckets, H] (nn.Embedding weight).
    """
    if qk_dots.ndim != 4:
        raise ValueError("qk_dots must be [batch, heads, i, j]")
    B, H, i, j = qk_dots.shape
    if rel_emb.shape != (num_buckets, H):
        raise ValueError("rel_emb must be [num_buckets, heads]")

    budget, vmem_limit = _vmem_budget_bytes()
    tq, tj = _pick_tiles(B, i, j, qk_dots.dtype.itemsize, budget)
    i_pad = _round_up(i, tq)
    j_pad = _round_up(j, tj)      # also guarantees lane-dense (>=128-wide) stores

    qk_in = qk_dots
    if i_pad != i or j_pad != j:
        qk_in = jnp.pad(qk_dots,
                        ((0, 0), (0, 0), (0, i_pad - i), (0, j_pad - j)))

    # Head-major table so the kernel does cheap scalar SMEM reads emb_t[h, b].
    emb_t = jnp.asarray(rel_emb, jnp.float32).T          # [H, num_buckets]

    kernel = functools.partial(
        _t5_bias_kernel, scale=float(scale), causal=bool(causal),
        num_buckets=int(num_buckets), max_distance=float(max_distance),
        seq_i=int(i), seq_j=int(j), tq=int(tq), tj=int(tj))

    qk_spec = pl.BlockSpec((B, 1, tq, tj), lambda q, k, h: (0, h, q, k))

    out = pl.pallas_call(
        kernel,
        out_shape=jax.ShapeDtypeStruct((B, H, i_pad, j_pad), qk_dots.dtype),
        grid_spec=pltpu.PrefetchScalarGridSpec(
            num_scalar_prefetch=0,
            grid=(i_pad // tq, j_pad // tj, H),
            in_specs=[
                pl.BlockSpec(memory_space=pltpu.MemorySpace.SMEM),  # bias table
                qk_spec,                                            # qk tile
            ],
            out_specs=qk_spec,
            scratch_shapes=[pltpu.VMEM((tq, tj), jnp.int32)],       # bucket cache
        ),
        compiler_params=pltpu.CompilerParams(
            dimension_semantics=("parallel", "parallel", "arbitrary"),
            vmem_limit_bytes=int(vmem_limit)),
        input_output_aliases={1: 0},          # update qk_dots in place
    )(emb_t, qk_in)

    if i_pad != i or j_pad != j:
        out = out[:, :, :i, :j]
    return out


def _reference(qk, emb, scale, causal, num_buckets, max_distance):
    """Plain-JAX reference of the PyTorch module's forward."""
    i, j = qk.shape[-2:]
    q_pos = jnp.arange(j - i, j)
    k_pos = jnp.arange(j)
    n = q_pos[:, None] - k_pos[None, :]       # == -(k - q)
    if causal:
        nb = num_buckets
        base = jnp.zeros_like(n)
        n = jnp.maximum(n, 0)
    else:
        nb = num_buckets // 2
        base = jnp.where(n < 0, nb, 0)
        n = jnp.abs(n)
    max_exact = nb // 2
    is_small = n < max_exact
    n_f = jnp.maximum(n.astype(jnp.float32), 1.0)
    val_large = max_exact + (
        jnp.log(n_f / float(max_exact))
        / math.log(max_distance / max_exact) * (nb - max_exact)
    ).astype(jnp.int32)
    val_large = jnp.minimum(val_large, nb - 1)
    bucket = base + jnp.where(is_small, n, val_large)
    bias = jnp.transpose(emb[bucket], (2, 0, 1))    # [heads, i, j]
    return qk + bias[None] * scale


if __name__ == "__main__":
    B, H = 2, 12                      # heads=12 matches the module default
    i, j = 8, 16                      # 8 queries attending over 16 keys (j >= i)
    num_buckets, max_distance = 32, 128
    scale = 1.0 / math.sqrt(64.0)

    key = jax.random.PRNGKey(0)
    kq, ke = jax.random.split(key)
    qk_dots = jax.random.normal(kq, (B, H, i, j), dtype=jnp.float32)
    rel_emb = 0.02 * jax.random.normal(ke, (num_buckets, H), dtype=jnp.float32)

    for causal in (False, True):
        ref = _reference(qk_dots, rel_emb, scale, causal, num_buckets, max_distance)
        out = t5_relative_position_bias(
            qk_dots, rel_emb, scale=scale, causal=causal,
            num_buckets=num_buckets, max_distance=max_distance)
        out = jax.block_until_ready(out)
        assert out.shape == qk_dots.shape
        assert jnp.allclose(out, ref, atol=1e-5, rtol=1e-5), f"mismatch causal={causal}"

    print("KERNEL_OK")
</pallas_src>

<mosaic_0001>
module attributes {stable_mosaic.version = 11 : i64} {
  func.func @_t5_bias_kernel(%arg0: i32, %arg1: i32, %arg2: i32, %arg3: memref<12x32xf32, #tpu.memory_space<smem>>, %arg4: memref<2x1x8x128xf32, #tpu.memory_space<vmem>>, %arg5: memref<2x1x8x128xf32, #tpu.memory_space<vmem>>, %arg6: memref<8x128xi32, #tpu.memory_space<vmem>>) attributes {dimension_semantics = [#tpu.dimension_semantics<parallel>, #tpu.dimension_semantics<parallel>, #tpu.dimension_semantics<arbitrary>], iteration_bounds = array<i64: 1, 1, 12>, scalar_prefetch = 0 : i64, scratch_operands = 1 : i64, tpu.core_type = #tpu.core_type<tc>, window_params = [{transform_indices = @transform_0, window_bounds = array<i64: 12, 32>}, {transform_indices = @transform_1, window_bounds = array<i64: 2, 1, 8, 128>}, {transform_indices = @transform_2, window_bounds = array<i64: 2, 1, 8, 128>}]} {
    %c0_i32 = arith.constant 0 : i32
    %0 = arith.cmpi eq, %arg2, %c0_i32 : i32
    %1 = arith.extui %0 : i1 to i32
    %c0_i32_0 = arith.constant 0 : i32
    %2 = arith.cmpi ne, %1, %c0_i32_0 : i32
    scf.if %2 {
      %c8_i32_44 = arith.constant 8 : i32
      %234 = arith.muli %arg0, %c8_i32_44 : i32
      %c128_i32 = arith.constant 128 : i32
      %235 = arith.muli %arg1, %c128_i32 : i32
      %236 = tpu.iota {dimensions = array<i32: 0>} : vector<8x128xi32>
      %237 = vector.broadcast %234 : i32 to vector<8x128xi32>
      %238 = arith.addi %236, %237 : vector<8x128xi32>
      %239 = tpu.iota {dimensions = array<i32: 1>} : vector<8x128xi32>
      %240 = vector.broadcast %235 : i32 to vector<8x128xi32>
      %241 = arith.addi %239, %240 : vector<8x128xi32>
      %c8_i32_45 = arith.constant 8 : i32
      %242 = vector.broadcast %c8_i32_45 : i32 to vector<8x128xi32>
      %243 = arith.addi %242, %238 : vector<8x128xi32>
      %244 = arith.subi %243, %241 : vector<8x128xi32>
      %c0_i32_46 = arith.constant 0 : i32
      %245 = vector.broadcast %c0_i32_46 : i32 to vector<8x128xi32>
      %246 = arith.cmpi slt, %244, %245 : vector<8x128xi32>
      %247 = arith.extui %246 : vector<8x128xi1> to vector<8x128xi32>
      %c16_i32_47 = arith.constant 16 : i32
      %248 = vector.broadcast %c16_i32_47 : i32 to vector<8x128xi32>
      %249 = arith.muli %247, %248 : vector<8x128xi32>
      %250 = math.absi %244 : vector<8x128xi32>
      %c8_i32_48 = arith.constant 8 : i32
      %251 = vector.broadcast %c8_i32_48 : i32 to vector<8x128xi32>
      %252 = arith.cmpi slt, %250, %251 : vector<8x128xi32>
      %253 = arith.sitofp %250 : vector<8x128xi32> to vector<8x128xf32>
      %cst_49 = arith.constant 1.000000e+00 : f32
      %254 = vector.broadcast %cst_49 : f32 to vector<8x128xf32>
      %255 = arith.maximumf %253, %254 : vector<8x128xf32>
      %cst_50 = arith.constant 1.250000e-01 : f32
      %256 = vector.broadcast %cst_50 : f32 to vector<8x128xf32>
      %257 = arith.mulf %255, %256 : vector<8x128xf32>
      %258 = math.log %257 : vector<8x128xf32>
      %cst_51 = arith.constant 2.885390e+00 : f32
      %259 = vector.broadcast %cst_51 : f32 to vector<8x128xf32>
      %260 = arith.mulf %258, %259 : vector<8x128xf32>
      %261 = arith.fptosi %260 : vector<8x128xf32> to vector<8x128xi32>
      %c8_i32_52 = arith.constant 8 : i32
      %262 = vector.broadcast %c8_i32_52 : i32 to vector<8x128xi32>
      %263 = arith.addi %262, %261 : vector<8x128xi32>
      %c15_i32_53 = arith.constant 15 : i32
      %264 = vector.broadcast %c15_i32_53 : i32 to vector<8x128xi32>
      %265 = arith.minsi %263, %264 : vector<8x128xi32>
      %266 = arith.select %252, %250, %265 : vector<8x128xi1>, vector<8x128xi32>
      %267 = arith.addi %249, %266 : vector<8x128xi32>
      %c0_54 = arith.constant 0 : index
      %c0_55 = arith.constant 0 : index
      %268 = vector.load %arg6[%c0_54, %c0_55] : memref<8x128xi32, #tpu.memory_space<vmem>>, vector<8x128xi32>
      tpu.vector_store %arg6[%c0_54, %c0_55], %267 {strides = array<i32>} : memref<8x128xi32, #tpu.memory_space<vmem>>, vector<8x128xi32>,
    } else {
    }
    %c0 = arith.constant 0 : index
    %c0_1 = arith.constant 0 : index
    %3 = vector.load %arg6[%c0, %c0_1] : memref<8x128xi32, #tpu.memory_space<vmem>>, vector<8x128xi32>
    %cst = arith.constant 0.000000e+00 : f32
    %4 = vector.broadcast %cst : f32 to vector<8x128xf32>
    %c0_i32_2 = arith.constant 0 : i32
    %5 = vector.broadcast %c0_i32_2 : i32 to vector<8x128xi32>
    %6 = arith.cmpi eq, %3, %5 : vector<8x128xi32>
    %7 = arith.index_cast %arg2 : i32 to index
    %c0_3 = arith.constant 0 : index
    %8 = memref.load %arg3[%7, %c0_3] : memref<12x32xf32, #tpu.memory_space<smem>>
    %cst_4 = arith.constant 1.250000e-01 : f32
    %9 = arith.mulf %8, %cst_4 : f32
    %10 = vector.broadcast %9 : f32 to vector<8x128xf32>
    %11 = arith.select %6, %10, %4 : vector<8x128xi1>, vector<8x128xf32>
    %c1_i32 = arith.constant 1 : i32
    %12 = vector.broadcast %c1_i32 : i32 to vector<8x128xi32>
    %13 = arith.cmpi eq, %3, %12 : vector<8x128xi32>
    %14 = arith.index_cast %arg2 : i32 to index
    %c1 = arith.constant 1 : index
    %15 = memref.load %arg3[%14, %c1] : memref<12x32xf32, #tpu.memory_space<smem>>
    %cst_5 = arith.constant 1.250000e-01 : f32
    %16 = arith.mulf %15, %cst_5 : f32
    %17 = vector.broadcast %16 : f32 to vector<8x128xf32>
    %18 = arith.select %13, %17, %11 : vector<8x128xi1>, vector<8x128xf32>
    %c2_i32 = arith.constant 2 : i32
    %19 = vector.broadcast %c2_i32 : i32 to vector<8x128xi32>
    %20 = arith.cmpi eq, %3, %19 : vector<8x128xi32>
    %21 = arith.index_cast %arg2 : i32 to index
    %c2 = arith.constant 2 : index
    %22 = memref.load %arg3[%21, %c2] : memref<12x32xf32, #tpu.memory_space<smem>>
    %cst_6 = arith.constant 1.250000e-01 : f32
    %23 = arith.mulf %22, %cst_6 : f32
    %24 = vector.broadcast %23 : f32 to vector<8x128xf32>
    %25 = arith.select %20, %24, %18 : vector<8x128xi1>, vector<8x128xf32>
    %c3_i32 = arith.constant 3 : i32
    %26 = vector.broadcast %c3_i32 : i32 to vector<8x128xi32>
    %27 = arith.cmpi eq, %3, %26 : vector<8x128xi32>
    %28 = arith.index_cast %arg2 : i32 to index
    %c3 = arith.constant 3 : index
    %29 = memref.load %arg3[%28, %c3] : memref<12x32xf32, #tpu.memory_space<smem>>
    %cst_7 = arith.constant 1.250000e-01 : f32
    %30 = arith.mulf %29, %cst_7 : f32
    %31 = vector.broadcast %30 : f32 to vector<8x128xf32>
    %32 = arith.select %27, %31, %25 : vector<8x128xi1>, vector<8x128xf32>
    %c4_i32 = arith.constant 4 : i32
    %33 = vector.broadcast %c4_i32 : i32 to vector<8x128xi32>
    %34 = arith.cmpi eq, %3, %33 : vector<8x128xi32>
    %35 = arith.index_cast %arg2 : i32 to index
    %c4 = arith.constant 4 : index
    %36 = memref.load %arg3[%35, %c4] : memref<12x32xf32, #tpu.memory_space<smem>>
    %cst_8 = arith.constant 1.250000e-01 : f32
    %37 = arith.mulf %36, %cst_8 : f32
    %38 = vector.broadcast %37 : f32 to vector<8x128xf32>
    %39 = arith.select %34, %38, %32 : vector<8x128xi1>, vector<8x128xf32>
    %c5_i32 = arith.constant 5 : i32
    %40 = vector.broadcast %c5_i32 : i32 to vector<8x128xi32>
    %41 = arith.cmpi eq, %3, %40 : vector<8x128xi32>
    %42 = arith.index_cast %arg2 : i32 to index
    %c5 = arith.constant 5 : index
    %43 = memref.load %arg3[%42, %c5] : memref<12x32xf32, #tpu.memory_space<smem>>
    %cst_9 = arith.constant 1.250000e-01 : f32
    %44 = arith.mulf %43, %cst_9 : f32
    %45 = vector.broadcast %44 : f32 to vector<8x128xf32>
    %46 = arith.select %41, %45, %39 : vector<8x128xi1>, vector<8x128xf32>
    %c6_i32 = arith.constant 6 : i32
    %47 = vector.broadcast %c6_i32 : i32 to vector<8x128xi32>
    %48 = arith.cmpi eq, %3, %47 : vector<8x128xi32>
    %49 = arith.index_cast %arg2 : i32 to index
    %c6 = arith.constant 6 : index
    %50 = memref.load %arg3[%49, %c6] : memref<12x32xf32, #tpu.memory_space<smem>>
    %cst_10 = arith.constant 1.250000e-01 : f32
    %51 = arith.mulf %50, %cst_10 : f32
    %52 = vector.broadcast %51 : f32 to vector<8x128xf32>
    %53 = arith.select %48, %52, %46 : vector<8x128xi1>, vector<8x128xf32>
    %c7_i32 = arith.constant 7 : i32
    %54 = vector.broadcast %c7_i32 : i32 to vector<8x128xi32>
    %55 = arith.cmpi eq, %3, %54 : vector<8x128xi32>
    %56 = arith.index_cast %arg2 : i32 to index
    %c7 = arith.constant 7 : index
    %57 = memref.load %arg3[%56, %c7] : memref<12x32xf32, #tpu.memory_space<smem>>
    %cst_11 = arith.constant 1.250000e-01 : f32
    %58 = arith.mulf %57, %cst_11 : f32
    %59 = vector.broadcast %58 : f32 to vector<8x128xf32>
    %60 = arith.select %55, %59, %53 : vector<8x128xi1>, vector<8x128xf32>
    %c8_i32 = arith.constant 8 : i32
    %61 = vector.broadcast %c8_i32 : i32 to vector<8x128xi32>
    %62 = arith.cmpi eq, %3, %61 : vector<8x128xi32>
    %63 = arith.index_cast %arg2 : i32 to index
    %c8 = arith.constant 8 : index
    %64 = memref.load %arg3[%63, %c8] : memref<12x32xf32, #tpu.memory_space<smem>>
    %cst_12 = arith.constant 1.250000e-01 : f32
    %65 = arith.mulf %64, %cst_12 : f32
    %66 = vector.broadcast %65 : f32 to vector<8x128xf32>
    %67 = arith.select %62, %66, %60 : vector<8x128xi1>, vector<8x128xf32>
    %c9_i32 = arith.constant 9 : i32
    %68 = vector.broadcast %c9_i32 : i32 to vector<8x128xi32>
    %69 = arith.cmpi eq, %3, %68 : vector<8x128xi32>
    %70 = arith.index_cast %arg2 : i32 to index
    %c9 = arith.constant 9 : index
    %71 = memref.load %arg3[%70, %c9] : memref<12x32xf32, #tpu.memory_space<smem>>
    %cst_13 = arith.constant 1.250000e-01 : f32
    %72 = arith.mulf %71, %cst_13 : f32
    %73 = vector.broadcast %72 : f32 to vector<8x128xf32>
    %74 = arith.select %69, %73, %67 : vector<8x128xi1>, vector<8x128xf32>
    %c10_i32 = arith.constant 10 : i32
    %75 = vector.broadcast %c10_i32 : i32 to vector<8x128xi32>
    %76 = arith.cmpi eq, %3, %75 : vector<8x128xi32>
    %77 = arith.index_cast %arg2 : i32 to index
    %c10 = arith.constant 10 : index
    %78 = memref.load %arg3[%77, %c10] : memref<12x32xf32, #tpu.memory_space<smem>>
    %cst_14 = arith.constant 1.250000e-01 : f32
    %79 = arith.mulf %78, %cst_14 : f32
    %80 = vector.broadcast %79 : f32 to vector<8x128xf32>
    %81 = arith.select %76, %80, %74 : vector<8x128xi1>, vector<8x128xf32>
    %c11_i32 = arith.constant 11 : i32
    %82 = vector.broadcast %c11_i32 : i32 to vector<8x128xi32>
    %83 = arith.cmpi eq, %3, %82 : vector<8x128xi32>
    %84 = arith.index_cast %arg2 : i32 to index
    %c11 = arith.constant 11 : index
    %85 = memref.load %arg3[%84, %c11] : memref<12x32xf32, #tpu.memory_space<smem>>
    %cst_15 = arith.constant 1.250000e-01 : f32
    %86 = arith.mulf %85, %cst_15 : f32
    %87 = vector.broadcast %86 : f32 to vector<8x128xf32>
    %88 = arith.select %83, %87, %81 : vector<8x128xi1>, vector<8x128xf32>
    %c12_i32 = arith.constant 12 : i32
    %89 = vector.broadcast %c12_i32 : i32 to vector<8x128xi32>
    %90 = arith.cmpi eq, %3, %89 : vector<8x128xi32>
    %91 = arith.index_cast %arg2 : i32 to index
    %c12 = arith.constant 12 : index
    %92 = memref.load %arg3[%91, %c12] : memref<12x32xf32, #tpu.memory_space<smem>>
    %cst_16 = arith.constant 1.250000e-01 : f32
    %93 = arith.mulf %92, %cst_16 : f32
    %94 = vector.broadcast %93 : f32 to vector<8x128xf32>
    %95 = arith.select %90, %94, %88 : vector<8x128xi1>, vector<8x128xf32>
    %c13_i32 = arith.constant 13 : i32
    %96 = vector.broadcast %c13_i32 : i32 to vector<8x128xi32>
    %97 = arith.cmpi eq, %3, %96 : vector<8x128xi32>
    %98 = arith.index_cast %arg2 : i32 to index
    %c13 = arith.constant 13 : index
    %99 = memref.load %arg3[%98, %c13] : memref<12x32xf32, #tpu.memory_space<smem>>
    %cst_17 = arith.constant 1.250000e-01 : f32
    %100 = arith.mulf %99, %cst_17 : f32
    %101 = vector.broadcast %100 : f32 to vector<8x128xf32>
    %102 = arith.select %97, %101, %95 : vector<8x128xi1>, vector<8x128xf32>
    %c14_i32 = arith.constant 14 : i32
    %103 = vector.broadcast %c14_i32 : i32 to vector<8x128xi32>
    %104 = arith.cmpi eq, %3, %103 : vector<8x128xi32>
    %105 = arith.index_cast %arg2 : i32 to index
    %c14 = arith.constant 14 : index
    %106 = memref.load %arg3[%105, %c14] : memref<12x32xf32, #tpu.memory_space<smem>>
    %cst_18 = arith.constant 1.250000e-01 : f32
    %107 = arith.mulf %106, %cst_18 : f32
    %108 = vector.broadcast %107 : f32 to vector<8x128xf32>
    %109 = arith.select %104, %108, %102 : vector<8x128xi1>, vector<8x128xf32>
    %c15_i32 = arith.constant 15 : i32
    %110 = vector.broadcast %c15_i32 : i32 to vector<8x128xi32>
    %111 = arith.cmpi eq, %3, %110 : vector<8x128xi32>
    %112 = arith.index_cast %arg2 : i32 to index
    %c15 = arith.constant 15 : index
    %113 = memref.load %arg3[%112, %c15] : memref<12x32xf32, #tpu.memory_space<smem>>
    %cst_19 = arith.constant 1.250000e-01 : f32
    %114 = arith.mulf %113, %cst_19 : f32
    %115 = vector.broadcast %114 : f32 to vector<8x128xf32>
    %116 = arith.select %111, %115, %109 : vector<8x128xi1>, vector<8x128xf32>
    %c16_i32 = arith.constant 16 : i32
    %117 = vector.broadcast %c16_i32 : i32 to vector<8x128xi32>
    %118 = arith.cmpi eq, %3, %117 : vector<8x128xi32>
    %119 = arith.index_cast %arg2 : i32 to index
    %c16 = arith.constant 16 : index
    %120 = memref.load %arg3[%119, %c16] : memref<12x32xf32, #tpu.memory_space<smem>>
    %cst_20 = arith.constant 1.250000e-01 : f32
    %121 = arith.mulf %120, %cst_20 : f32
    %122 = vector.broadcast %121 : f32 to vector<8x128xf32>
    %123 = arith.select %118, %122, %116 : vector<8x128xi1>, vector<8x128xf32>
    %c17_i32 = arith.constant 17 : i32
    %124 = vector.broadcast %c17_i32 : i32 to vector<8x128xi32>
    %125 = arith.cmpi eq, %3, %124 : vector<8x128xi32>
    %126 = arith.index_cast %arg2 : i32 to index
    %c17 = arith.constant 17 : index
    %127 = memref.load %arg3[%126, %c17] : memref<12x32xf32, #tpu.memory_space<smem>>
    %cst_21 = arith.constant 1.250000e-01 : f32
    %128 = arith.mulf %127, %cst_21 : f32
    %129 = vector.broadcast %128 : f32 to vector<8x128xf32>
    %130 = arith.select %125, %129, %123 : vector<8x128xi1>, vector<8x128xf32>
    %c18_i32 = arith.constant 18 : i32
    %131 = vector.broadcast %c18_i32 : i32 to vector<8x128xi32>
    %132 = arith.cmpi eq, %3, %131 : vector<8x128xi32>
    %133 = arith.index_cast %arg2 : i32 to index
    %c18 = arith.constant 18 : index
    %134 = memref.load %arg3[%133, %c18] : memref<12x32xf32, #tpu.memory_space<smem>>
    %cst_22 = arith.constant 1.250000e-01 : f32
    %135 = arith.mulf %134, %cst_22 : f32
    %136 = vector.broadcast %135 : f32 to vector<8x128xf32>
    %137 = arith.select %132, %136, %130 : vector<8x128xi1>, vector<8x128xf32>
    %c19_i32 = arith.constant 19 : i32
    %138 = vector.broadcast %c19_i32 : i32 to vector<8x128xi32>
    %139 = arith.cmpi eq, %3, %138 : vector<8x128xi32>
    %140 = arith.index_cast %arg2 : i32 to index
    %c19 = arith.constant 19 : index
    %141 = memref.load %arg3[%140, %c19] : memref<12x32xf32, #tpu.memory_space<smem>>
    %cst_23 = arith.constant 1.250000e-01 : f32
    %142 = arith.mulf %141, %cst_23 : f32
    %143 = vector.broadcast %142 : f32 to vector<8x128xf32>
    %144 = arith.select %139, %143, %137 : vector<8x128xi1>, vector<8x128xf32>
    %c20_i32 = arith.constant 20 : i32
    %145 = vector.broadcast %c20_i32 : i32 to vector<8x128xi32>
    %146 = arith.cmpi eq, %3, %145 : vector<8x128xi32>
    %147 = arith.index_cast %arg2 : i32 to index
    %c20 = arith.constant 20 : index
    %148 = memref.load %arg3[%147, %c20] : memref<12x32xf32, #tpu.memory_space<smem>>
    %cst_24 = arith.constant 1.250000e-01 : f32
    %149 = arith.mulf %148, %cst_24 : f32
    %150 = vector.broadcast %149 : f32 to vector<8x128xf32>
    %151 = arith.select %146, %150, %144 : vector<8x128xi1>, vector<8x128xf32>
    %c21_i32 = arith.constant 21 : i32
    %152 = vector.broadcast %c21_i32 : i32 to vector<8x128xi32>
    %153 = arith.cmpi eq, %3, %152 : vector<8x128xi32>
    %154 = arith.index_cast %arg2 : i32 to index
    %c21 = arith.constant 21 : index
    %155 = memref.load %arg3[%154, %c21] : memref<12x32xf32, #tpu.memory_space<smem>>
    %cst_25 = arith.constant 1.250000e-01 : f32
    %156 = arith.mulf %155, %cst_25 : f32
    %157 = vector.broadcast %156 : f32 to vector<8x128xf32>
    %158 = arith.select %153, %157, %151 : vector<8x128xi1>, vector<8x128xf32>
    %c22_i32 = arith.constant 22 : i32
    %159 = vector.broadcast %c22_i32 : i32 to vector<8x128xi32>
    %160 = arith.cmpi eq, %3, %159 : vector<8x128xi32>
    %161 = arith.index_cast %arg2 : i32 to index
    %c22 = arith.constant 22 : index
    %162 = memref.load %arg3[%161, %c22] : memref<12x32xf32, #tpu.memory_space<smem>>
    %cst_26 = arith.constant 1.250000e-01 : f32
    %163 = arith.mulf %162, %cst_26 : f32
    %164 = vector.broadcast %163 : f32 to vector<8x128xf32>
    %165 = arith.select %160, %164, %158 : vector<8x128xi1>, vector<8x128xf32>
    %c23_i32 = arith.constant 23 : i32
    %166 = vector.broadcast %c23_i32 : i32 to vector<8x128xi32>
    %167 = arith.cmpi eq, %3, %166 : vector<8x128xi32>
    %168 = arith.index_cast %arg2 : i32 to index
    %c23 = arith.constant 23 : index
    %169 = memref.load %arg3[%168, %c23] : memref<12x32xf32, #tpu.memory_space<smem>>
    %cst_27 = arith.constant 1.250000e-01 : f32
    %170 = arith.mulf %169, %cst_27 : f32
    %171 = vector.broadcast %170 : f32 to vector<8x128xf32>
    %172 = arith.select %167, %171, %165 : vector<8x128xi1>, vector<8x128xf32>
    %c24_i32 = arith.constant 24 : i32
    %173 = vector.broadcast %c24_i32 : i32 to vector<8x128xi32>
    %174 = arith.cmpi eq, %3, %173 : vector<8x128xi32>
    %175 = arith.index_cast %arg2 : i32 to index
    %c24 = arith.constant 24 : index
    %176 = memref.load %arg3[%175, %c24] : memref<12x32xf32, #tpu.memory_space<smem>>
    %cst_28 = arith.constant 1.250000e-01 : f32
    %177 = arith.mulf %176, %cst_28 : f32
    %178 = vector.broadcast %177 : f32 to vector<8x128xf32>
    %179 = arith.select %174, %178, %172 : vector<8x128xi1>, vector<8x128xf32>
    %c25_i32 = arith.constant 25 : i32
    %180 = vector.broadcast %c25_i32 : i32 to vector<8x128xi32>
    %181 = arith.cmpi eq, %3, %180 : vector<8x128xi32>
    %182 = arith.index_cast %arg2 : i32 to index
    %c25 = arith.constant 25 : index
    %183 = memref.load %arg3[%182, %c25] : memref<12x32xf32, #tpu.memory_space<smem>>
    %cst_29 = arith.constant 1.250000e-01 : f32
    %184 = arith.mulf %183, %cst_29 : f32
    %185 = vector.broadcast %184 : f32 to vector<8x128xf32>
    %186 = arith.select %181, %185, %179 : vector<8x128xi1>, vector<8x128xf32>
    %c26_i32 = arith.constant 26 : i32
    %187 = vector.broadcast %c26_i32 : i32 to vector<8x128xi32>
    %188 = arith.cmpi eq, %3, %187 : vector<8x128xi32>
    %189 = arith.index_cast %arg2 : i32 to index
    %c26 = arith.constant 26 : index
    %190 = memref.load %arg3[%189, %c26] : memref<12x32xf32, #tpu.memory_space<smem>>
    %cst_30 = arith.constant 1.250000e-01 : f32
    %191 = arith.mulf %190, %cst_30 : f32
    %192 = vector.broadcast %191 : f32 to vector<8x128xf32>
    %193 = arith.select %188, %192, %186 : vector<8x128xi1>, vector<8x128xf32>
    %c27_i32 = arith.constant 27 : i32
    %194 = vector.broadcast %c27_i32 : i32 to vector<8x128xi32>
    %195 = arith.cmpi eq, %3, %194 : vector<8x128xi32>
    %196 = arith.index_cast %arg2 : i32 to index
    %c27 = arith.constant 27 : index
    %197 = memref.load %arg3[%196, %c27] : memref<12x32xf32, #tpu.memory_space<smem>>
    %cst_31 = arith.constant 1.250000e-01 : f32
    %198 = arith.mulf %197, %cst_31 : f32
    %199 = vector.broadcast %198 : f32 to vector<8x128xf32>
    %200 = arith.select %195, %199, %193 : vector<8x128xi1>, vector<8x128xf32>
    %c28_i32 = arith.constant 28 : i32
    %201 = vector.broadcast %c28_i32 : i32 to vector<8x128xi32>
    %202 = arith.cmpi eq, %3, %201 : vector<8x128xi32>
    %203 = arith.index_cast %arg2 : i32 to index
    %c28 = arith.constant 28 : index
    %204 = memref.load %arg3[%203, %c28] : memref<12x32xf32, #tpu.memory_space<smem>>
    %cst_32 = arith.constant 1.250000e-01 : f32
    %205 = arith.mulf %204, %cst_32 : f32
    %206 = vector.broadcast %205 : f32 to vector<8x128xf32>
    %207 = arith.select %202, %206, %200 : vector<8x128xi1>, vector<8x128xf32>
    %c29_i32 = arith.constant 29 : i32
    %208 = vector.broadcast %c29_i32 : i32 to vector<8x128xi32>
    %209 = arith.cmpi eq, %3, %208 : vector<8x128xi32>
    %210 = arith.index_cast %arg2 : i32 to index
    %c29 = arith.constant 29 : index
    %211 = memref.load %arg3[%210, %c29] : memref<12x32xf32, #tpu.memory_space<smem>>
    %cst_33 = arith.constant 1.250000e-01 : f32
    %212 = arith.mulf %211, %cst_33 : f32
    %213 = vector.broadcast %212 : f32 to vector<8x128xf32>
    %214 = arith.select %209, %213, %207 : vector<8x128xi1>, vector<8x128xf32>
    %c30_i32 = arith.constant 30 : i32
    %215 = vector.broadcast %c30_i32 : i32 to vector<8x128xi32>
    %216 = arith.cmpi eq, %3, %215 : vector<8x128xi32>
    %217 = arith.index_cast %arg2 : i32 to index
    %c30 = arith.constant 30 : index
    %218 = memref.load %arg3[%217, %c30] : memref<12x32xf32, #tpu.memory_space<smem>>
    %cst_34 = arith.constant 1.250000e-01 : f32
    %219 = arith.mulf %218, %cst_34 : f32
    %220 = vector.broadcast %219 : f32 to vector<8x128xf32>
    %221 = arith.select %216, %220, %214 : vector<8x128xi1>, vector<8x128xf32>
    %c31_i32 = arith.constant 31 : i32
    %222 = vector.broadcast %c31_i32 : i32 to vector<8x128xi32>
    %223 = arith.cmpi eq, %3, %222 : vector<8x128xi32>
    %224 = arith.index_cast %arg2 : i32 to index
    %c31 = arith.constant 31 : index
    %225 = memref.load %arg3[%224, %c31] : memref<12x32xf32, #tpu.memory_space<smem>>
    %cst_35 = arith.constant 1.250000e-01 : f32
    %226 = arith.mulf %225, %cst_35 : f32
    %227 = vector.broadcast %226 : f32 to vector<8x128xf32>
    %228 = arith.select %223, %227, %221 : vector<8x128xi1>, vector<8x128xf32>
    %c0_36 = arith.constant 0 : index
    %c0_37 = arith.constant 0 : index
    %c0_38 = arith.constant 0 : index
    %c0_39 = arith.constant 0 : index
    %229 = vector.load %arg4[%c0_36, %c0_37, %c0_38, %c0_39] : memref<2x1x8x128xf32, #tpu.memory_space<vmem>>, vector<2x1x8x128xf32>
    %230 = vector.shape_cast %228 : vector<8x128xf32> to vector<1x1x8x128xf32>
    %231 = vector.broadcast %230 : vector<1x1x8x128xf32> to vector<2x1x8x128xf32>
    %232 = arith.addf %229, %231 : vector<2x1x8x128xf32>
    %c0_40 = arith.constant 0 : index
    %c0_41 = arith.constant 0 : index
    %c0_42 = arith.constant 0 : index
    %c0_43 = arith.constant 0 : index
    %233 = vector.load %arg5[%c0_40, %c0_41, %c0_42, %c0_43] : memref<2x1x8x128xf32, #tpu.memory_space<vmem>>, vector<2x1x8x128xf32>
    tpu.vector_store %arg5[%c0_40, %c0_41, %c0_42, %c0_43], %232 {strides = array<i32>} : memref<2x1x8x128xf32, #tpu.memory_space<vmem>>, vector<2x1x8x128xf32>,
    return
  }
  func.func @transform_0(%arg0: i32, %arg1: i32, %arg2: i32) -> (i32, i32) {
    %c0_i32 = arith.constant 0 : i32
    %c0_i32_0 = arith.constant 0 : i32
    %c0_i32_1 = arith.constant 0 : i32
    return %c0_i32, %c0_i32_0 : i32, i32
  }
  func.func @transform_1(%arg0: i32, %arg1: i32, %arg2: i32) -> (i32, i32, i32, i32) {
    %c0_i32 = arith.constant 0 : i32
    %c0_i32_0 = arith.constant 0 : i32
    return %c0_i32, %arg2, %arg0, %arg1 : i32, i32, i32, i32
  }
  func.func @transform_2(%arg0: i32, %arg1: i32, %arg2: i32) -> (i32, i32, i32, i32) {
    %c0_i32 = arith.constant 0 : i32
    %c0_i32_0 = arith.constant 0 : i32
    return %c0_i32, %arg2, %arg0, %arg1 : i32, i32, i32, i32
  }
}

</mosaic_0001>

<bundles_post_ra>
// kernel: tpu_custom_call.1
= control target key start
LH: loop header
LB: loop body
LE: loop exit
PB: predicated region body
PF: predicated region fallthrough
CT: control target
= control target key end

     0   :  { %7 = vsyncpa [#allocation6], 0  ;;  %s1161_s0 = inlined_call_operand.vmem [shape: f32[12,32], index: 0, kind: input, shape index: {}]   ;;  %s1162_s1 = inlined_call_operand.hbm [shape: f32[2,12,8,128], index: 1, kind: input, shape index: {}, may-alias: {1,2}]   ;;  %s1163_s2 = inlined_call_operand.hbm [shape: f32[2,12,8,128], index: 2, kind: output, shape index: {}, may-alias: {1,2}]  }
   0x1   :  { %8 = vsyncpa [#allocation4], 0 }
   0x2   :  { %10 = vsyncpa [#allocation4 + $0x1], 0 }
   0x3   :  { %11 = vsyncpa [#allocation5], 0 }
   0x4   :  { %13 = vsyncpa [#allocation5 + $0x1], 0  ;;  %s815_s9 = smov 0   ;;  %s817_s10 = smov 0  }
   0x5   :  { %s819_s11 = smov 0   ;;  %s821_s12 = smov 0  }
   0x6   :  { %s823_s13 = smov 0   ;;  %s825_s14 = smov 0  }
   0x7 LB: > { %s555_s15 = sadd.s32 4294967295, %s788_s14   ;;  %s556_s16 = sadd.s32 4294967294, %s788_s14   ;;  %s788_s14 = sphi %s825_s14, %s19_s14   ;;  %s784_s13 = sphi %s823_s13, %s1185_s13   ;;  %s780_s12 = sphi %s821_s12, %s1184_s12   ;;  %s776_s11 = sphi %s819_s11, %s1183_s11   ;;  %s772_s10 = sphi %s817_s10, %s1182_s10   ;;  %s768_s9 = sphi %s815_s9, %s1181_s9  }
   0x8   : > { %p83_p0 = scmp.ne.s32.totalorder %s772_s10, %s768_s9  ;;  %p849_p1 = scmp.eq.s32.totalorder %s555_s15, 0 }
   0x9   : > { %p853_p2 = scmp.eq.s32.totalorder %s555_s15, 11  ;;  %p117_p3 = scmp.eq.s32.totalorder %s556_s16, 11 }
   0xa   : > { %s1168_s17 = scalar_select %p849_p1, 1, 0 }
   0xb   : > { %p859_p4 = por %p849_p1, %p83_p0  ;;  %p557_p5 = scmp.ge.s32.totalorder %s788_s14, 1 }
   0xc   : > { %p864_p6 = por %p117_p3, %p83_p0  ;;  %p124_p7 = scmp.lt.s32.totalorder %s788_s14, 13 }
   0xd   : > { %s1170_s19 = scalar_select %p859_p4, 1, 0 }
   0xe   : > { %s1171_s20 = scalar_select %p864_p6, 1, 0 }
   0xf   : > { %s136_s23 = sshll.u32 %s1161_s0, 4  ;;  %p872_p8 = pnand %p557_p5, %p124_p7  ;;  %s137_s23 = int_to_ptr.vmem [resolvable:$true] %s136_s23 }
  0x10   : > { %s31_s26 = sadd.s32 1, %s784_s13  ;;  %s657_s27 = scalar_lea.vmem %s137_s23, 256 }
  0x11   : > { %p583_p9 = pneg %p872_p8  ;;  %p658_p11 = scmp.ne.s32.totalorder %s137_s23, %s657_s27 }
  0x12   : > { %p665_p3 = scmp.lt.s32.totalorder %s137_s23, %s137_s23  ;;  %p666_p5 = scmp.lt.s32.totalorder %s657_s27, %s657_s27 }
  0x13   : > { %p880_p10 = pnand %p583_p9, %p849_p1 }
  0x14   : > { %p667_p7 = por %p666_p5, %p665_p3 }
  0x15   : > { %p659_p12 = pneg %p880_p10 }
  0x17   : > { %p660_p13 = pnand %p659_p12, %p658_p11 }
  0x19   : > { %p661_p0 = pneg %p660_p13 }
  0x1b   : > { %p668_p6 = pnand %p667_p7, %p661_p0 }
  0x1d   : > { %671 = shalt.err (!%p668_p6)
}
  0x1e   : > { %s790_s28 = smov [#allocation3]   ;;  %s791_s29 = smov 128  }
  0x1f   : > { %s792_s30 = smov 8   ;;  %p32_p6 = scmp.ge.s32.totalorder %s31_s26, 12 }
  0x20   : > { %586 = dma.vmem_to_smem (!%p880_p10), %s137_s23, 256, %s790_s28, [#allocation6], %s791_s29, %s791_s29, %s792_s30  }
  0x21   : > { %s70_s3 = sadd.s32 1, %s776_s11  ;;  %p77_p9 = scmp.ne.s32.totalorder %s776_s11, %s772_s10 }
  0x22   : > { %p78_p11 = scmp.eq.s32.totalorder %s788_s14, 0  ;;  %s1187_s26 = smov (%p32_p6, %s31_s26), 0 }
  0x23   : > { %p904_p13 = por %p853_p2, %p77_p9  ;;  %s63_s6 = ssub.s32 %s784_s13, %s1187_s26 }
  0x24   : > { %p898_p12 = por %p78_p11, %p77_p9  ;;  %p596_p0 = scmp.lt.s32.totalorder %s788_s14, 12 }
  0x25   : > { %s1175_s5 = scalar_select %p904_p13, 1, 0 }
  0x26   : > { %p68_p10 = scmp.eq.s32.totalorder %s63_s6, 0  ;;  %s150_s7 = sand.u32 1, %s776_s11  }
  0x27   : > { %s560_s8 = sshll.u32 %s150_s7, 4  ;;  %s561_s16 = sshll.u32 %s784_s13, 7 }
  0x28   : > { %s913_s15 = scalar_select %p68_p10, %s776_s11, %s70_s3  }
  0x29   : > { %s919_s23 = scalar_lea.hbm %s1162_s1, %s561_s16  ;;  %s154_s18 = scalar_lea.vmem [#allocation7], %s560_s8 }
  0x2a   : > { %s162_s25 = sshll.u32 %s154_s18, 4  ;;  %p925_p2 = pnand %p596_p0, %p898_p12  ;;  %s921_s25 = int_to_ptr.vmem [resolvable:$true] %s162_s25 }
  0x2b   : > { %s929_s28 = scalar_lea.sflag [#allocation4], %s150_s7  ;;  %s672_s3 = scalar_lea.hbm %s919_s23, 256 }
  0x2c   : > { %p673_p3 = scmp.ne.s32.totalorder %s919_s23, %s672_s3  ;;  %p674_p5 = pneg %p925_p2 }
  0x2d   : > { %s677_s4 = scalar_lea.hbm %s1162_s1, 3072  ;;  %p678_p9 = scmp.lt.u32.totalorder %s919_s23, %s1162_s1 }
  0x2e   : > { %p675_p7 = pnand %p674_p5, %p673_p3  ;;  %p679_p11 = scmp.lt.u32.totalorder %s677_s4, %s672_s3 }
  0x2f   : > { %p681_p0 = scmp.lt.u32.totalorder %s672_s3, %s919_s23 }
  0x30   : > { %p676_p6 = pneg %p675_p7  ;;  %p680_p12 = por %p679_p11, %p678_p9 }
  0x32   : > { %p682_p10 = por %p681_p0, %p680_p12 }
  0x34   : > { %p683_p13 = pnand %p682_p10, %p676_p6 }
  0x36   : > { %686 = shalt.err (!%p683_p13)
}
  0x37   : > { %s687_s7 = scalar_lea.vmem %s921_s25, 256  ;;  %s793_s22 = smov [#allocation7]  }
  0x38   : > { %p688_p3 = scmp.ne.s32.totalorder %s921_s25, %s687_s7  ;;  %s692_s18 = sshll.u32 %s793_s22, 4  ;;  %s693_s18 = int_to_ptr.vmem [resolvable:$false] %s692_s18 }
  0x39   : > { %s694_s6 = scalar_lea.vmem %s693_s18, 512  ;;  %p695_p1 = scmp.lt.s32.totalorder %s921_s25, %s693_s18 }
  0x3a   : > { %p690_p7 = pnand %p688_p3, %p674_p5  ;;  %p696_p9 = scmp.lt.s32.totalorder %s694_s6, %s687_s7 }
  0x3c   : > { %p691_p4 = pneg %p690_p7  ;;  %p697_p11 = por %p696_p9, %p695_p1 }
  0x3e   : > { %p698_p12 = pnand %p697_p11, %p691_p4 }
  0x40   : > { %701 = shalt.err (!%p698_p12)
}
  0x41   : > { %s794_s3 = smov 1536   ;;  %174 = sbr.rel (%p872_p8) target bundleno = 200 (0xc8), region = 28 }
  0x42   : > { %590 = dma.hbm_to_vmem [thread:$0]  (!%p925_p2), %s919_s23, 256, %s921_s25, %s929_s28, %s794_s3, %s791_s29, %s792_s30  }
  0x43   : > { %p1177_p13 = scmp.ne.s32.totalorder (!%p872_p8), %s1168_s17, 0 }
  0x48   : > { %755 = dma.done.wait (%p1177_p13), [#allocation6], 256  }
  0x49   : > { %757 = vsyncadd (%p1177_p13), [#allocation6], 4294967040  ;;  %s966_s8 = sand.u32 1, %s772_s10   ;;  %p1178_p1 = scmp.ne.s32.totalorder %s1170_s19, 0 }
  0x4a   : > { %s564_s27 = sshll.u32 %s966_s8, 4  ;;  %s181_s4 = scalar_lea.sflag [#allocation4], %s966_s8 }
  0x4b   : > { %s970_s16 = scalar_lea.vmem [#allocation7], %s564_s27 }
  0x4c   : > { %759 = dma.done.wait (%p1178_p1), %s181_s4, 256  }
  0x4d   : > { %761 = vsyncadd (%p1178_p1), %s181_s4, 4294967040 }
  0x4e   : > { %189 = sfence }
  0x4f   : > { %s976_s24 = scalar_lea.vmem [#allocation8], %s564_s27  ;;  %p566_p4 = scmp.ne.s32.totalorder %s780_s12, 0 }
  0x50   : > { %v212_v0 = vlaneseq (!%p566_p4)  ;;  %v795_v14 = vmov (!%p566_p4), 0  }
  0x51   : > { %209 = sbr.rel (%p566_p4) target bundleno = 125 (0x7d), region = 40 }
  0x52   : > { %v213_v1 = vshrl.u32 (!%p566_p4), %v212_v0, 7  ;;  %v217_v2 = vand.u32 (!%p566_p4), 127, %v212_v0 }
  0x54   : > { %v220_v3 = vadd.s32 (!%p566_p4), 8, %v213_v1 }
  0x56   : > { %v221_v4 = vsub.s32 (!%p566_p4), %v220_v3, %v217_v2 }
  0x58   : > { %v225_v5 = vsub.s32 0, %v221_v4  ;;  %vm222_vm0 = vcmp.lt.s32.totalorder %v221_v4, 0 }
  0x59   : > { %v223_v15 = vsel %vm222_vm0, 1, %v795_v14 }
  0x5a   : > { %v567_v6 = vmin.u32 %v225_v5, %v221_v4  ;;  %v224_v18 = vmul.u32 16, %v223_v15 }
  0x5c   : > { %v228_v7 = vcvt.s32.f32 %v567_v6  ;;  %vm227_vm1 = vcmp.lt.s32.totalorder %v567_v6, 8 }
  0x5e   : > { %v229_v8 = vmax.f32 %v228_v7, 1.0 }
  0x60   : > { %v230_v9 = vmul.f32 0.125, %v229_v8 }
  0x62   : > { %655 = vlog2.f32 %v230_v9 }
  0x6c   : > { %v656_v10 = vpop.eup %655 }
  0x6d   : > { %v232_v11 = vmul.f32 0.6931472, %v656_v10 }
  0x6f   : > { %v233_v12 = vmul.f32 2.88539, %v232_v11 }
  0x71   : > { %v573_v13 = vtrunc.f32 %v233_v12 }
  0x73   : > { %v574_v16 = vcvt.f32.s32 %v573_v13 }
  0x75   : > { %v235_v17 = vadd.s32 8, %v574_v16 }
  0x77   : > { %vm236_vm2 = vcmp.lt.s32.totalorder %v235_v17, 15 }
  0x78   : > { %v237_v19 = vsel %vm236_vm2, %v235_v17, 15 }
  0x79   : > { %v238_v20 = vsel %vm227_vm1, %v567_v6, %v237_v19 }
  0x7a   : > { %v239_v21 = vadd.s32 %v238_v20, %v224_v18 }
  0x7c   : > { %240 = vst [vmem:[#allocation2] sm:$0xff] %v239_v21 }
  0x7d PF: > { %s980_s17 = sshll.u32 %s780_s12, 7  ;;  %v434_v21 = vld [vmem:[%s970_s16] sm:$0xff]  ;;  %p1179_p2 = scmp.ne.s32.totalorder %s1175_s5, 0 }
  0x7e   : > { %s244_s19 = sld [smem:[#allocation3 + %s980_s17]]  ;;  %s249_s29 = sadd.s32 1, %s980_s17 }
  0x7f   : > { %s250_s30 = sld [smem:[#allocation3 + %s249_s29]]  ;;  %s255_s23 = sadd.s32 2, %s980_s17 }
  0x80   : > { %s256_s25 = sld [smem:[#allocation3 + %s255_s23]]  ;;  %s261_s28 = sadd.s32 3, %s980_s17 }
  0x81   : > { %s262_s21 = sld [smem:[#allocation3 + %s261_s28]]  ;;  %s267_s7 = sadd.s32 4, %s980_s17 }
  0x82   : > { %s989_s12 = sld [smem:[#allocation3 + %s267_s7]]  ;;  %s273_s22 = sadd.s32 5, %s980_s17 }
  0x83   : > { %v986_v22 = vld [vmem:[#allocation2] sm:$0xff]  ;;  %s992_s18 = sld [smem:[#allocation3 + %s273_s22]]  ;;  %s279_s6 = sadd.s32 6, %s980_s17 }
  0x84   : > { %vm242_vm3 = vcmp.eq.s32.totalorder %v986_v22, 0  ;;  %s245_s3 = smul.f32 0.125, %s244_s19  ;;  %s996_s27 = sld [smem:[#allocation3 + %s279_s6]]  ;;  %vm248_vm4 = vcmp.eq.s32.totalorder %v986_v22, 1  ;;  %vm254_vm5 = vcmp.eq.s32.totalorder %v986_v22, 2  ;;  %vm260_vm6 = vcmp.eq.s32.totalorder %v986_v22, 3 }
  0x85   : > { %s251_s4 = smul.f32 0.125, %s250_s30  ;;  %s285_s29 = sadd.s32 7, %s980_s17  ;;  %vm266_vm7 = vcmp.eq.s32.totalorder %v986_v22, 4  ;;  %vm272_vm8 = vcmp.eq.s32.totalorder %v986_v22, 5  ;;  %vm278_vm9 = vcmp.eq.s32.totalorder %v986_v22, 6  ;;  %vm284_vm10 = vcmp.eq.s32.totalorder %v986_v22, 7 }
  0x86   : > { %v246_v23 = vstv %s245_s3  ;;  %s257_s23 = smul.f32 0.125, %s256_s25  ;;  %s1001_s28 = sld [smem:[#allocation3 + %s285_s29]]  ;;  %vm290_vm11 = vcmp.eq.s32.totalorder %v986_v22, 8  ;;  %vm296_vm12 = vcmp.eq.s32.totalorder %v986_v22, 9  ;;  %vm302_vm13 = vcmp.eq.s32.totalorder %v986_v22, 10 }
  0x87   : > { %v247_v24 = vsel %vm242_vm3, %v246_v23, 0.0  ;;  %v252_v25 = vstv %s251_s4  ;;  %s263_s19 = smul.f32 0.125, %s262_s21  ;;  %s291_s7 = sadd.s32 8, %s980_s17  ;;  %vm308_vm14 = vcmp.eq.s32.totalorder %v986_v22, 11  ;;  %vm314_vm15 = vcmp.eq.s32.totalorder %v986_v22, 12  ;;  %v435_v23 = vld [vmem:[%s970_s16 + $0x8] sm:$0xff] }
  0x88   : > { %v253_v26 = vsel %vm248_vm4, %v252_v25, %v247_v24  ;;  %v258_v27 = vstv %s257_s23  ;;  %s269_s30 = smul.f32 0.125, %s989_s12  ;;  %s1007_s22 = sld [smem:[#allocation3 + %s291_s7]]  ;;  %vm320_vm0 = vcmp.eq.s32.totalorder %v986_v22, 13  ;;  %vm326_vm1 = vcmp.eq.s32.totalorder %v986_v22, 14 }
  0x89   : > { %v259_v28 = vsel %vm254_vm5, %v258_v27, %v253_v26  ;;  %v264_v29 = vstv %s263_s19  ;;  %s275_s25 = smul.f32 0.125, %s992_s18  ;;  %s297_s6 = sadd.s32 9, %s980_s17  ;;  %vm332_vm2 = vcmp.eq.s32.totalorder %v986_v22, 15  ;;  %vm338_vm3 = vcmp.eq.s32.totalorder %v986_v22, 16 }
  0x8a   : > { %v265_v30 = vsel %vm260_vm6, %v264_v29, %v259_v28  ;;  %v270_v31 = vstv %s269_s30  ;;  %s281_s21 = smul.f32 0.125, %s996_s27  ;;  %s298_s3 = sld [smem:[#allocation3 + %s297_s6]]  ;;  %vm344_vm4 = vcmp.eq.s32.totalorder %v986_v22, 17  ;;  %vm350_vm5 = vcmp.eq.s32.totalorder %v986_v22, 18 }
  0x8b   : > { %v271_v32 = vsel %vm266_vm7, %v270_v31, %v265_v30  ;;  %v276_v33 = vstv %s275_s25  ;;  %s303_s12 = sadd.s32 10, %s980_s17  ;;  %s309_s4 = sadd.s32 11, %s980_s17  ;;  %vm356_vm6 = vcmp.eq.s32.totalorder %v986_v22, 19  ;;  %vm362_vm7 = vcmp.eq.s32.totalorder %v986_v22, 20 }
  0x8c   : > { %v277_v34 = vsel %vm272_vm8, %v276_v33, %v271_v32  ;;  %v282_v35 = vstv %s281_s21  ;;  %s287_s18 = smul.f32 0.125, %s1001_s28  ;;  %s304_s29 = sld [smem:[#allocation3 + %s303_s12]]  ;;  %vm368_vm8 = vcmp.eq.s32.totalorder %v986_v22, 21 }
  0x8d   : > { %v283_v36 = vsel %vm278_vm9, %v282_v35, %v277_v34  ;;  %s1018_s23 = sld [smem:[#allocation3 + %s309_s4]]  ;;  %s315_s19 = sadd.s32 12, %s980_s17  ;;  %vm374_vm9 = vcmp.eq.s32.totalorder %v986_v22, 22 }
  0x8e   : > { %v288_v37 = vstv %s287_s18  ;;  %s293_s27 = smul.f32 0.125, %s1007_s22  ;;  %s316_s7 = sld [smem:[#allocation3 + %s315_s19]] }
  0x8f   : > { %v289_v38 = vsel %vm284_vm10, %v288_v37, %v283_v36  ;;  %s321_s30 = sadd.s32 13, %s980_s17  ;;  %s327_s25 = sadd.s32 14, %s980_s17  ;;  %vm380_vm10 = vcmp.eq.s32.totalorder %v986_v22, 23 }
  0x90   : > { %v294_v39 = vstv %s293_s27  ;;  %s299_s28 = smul.f32 0.125, %s298_s3  ;;  %s1026_s6 = sld [smem:[#allocation3 + %s321_s30]] }
  0x91   : > { %v295_v40 = vsel %vm290_vm11, %v294_v39, %v289_v38  ;;  %s1028_s21 = sld [smem:[#allocation3 + %s327_s25]]  ;;  %s333_s12 = sadd.s32 15, %s980_s17  ;;  %vm386_vm11 = vcmp.eq.s32.totalorder %v986_v22, 24 }
  0x92   : > { %v300_v41 = vstv %s299_s28  ;;  %s305_s22 = smul.f32 0.125, %s304_s29  ;;  %s1032_s4 = sld [smem:[#allocation3 + %s333_s12]] }
  0x93   : > { %v301_v42 = vsel %vm296_vm12, %v300_v41, %v295_v40  ;;  %s311_s18 = smul.f32 0.125, %s1018_s23  ;;  %s339_s3 = sadd.s32 16, %s980_s17  ;;  %vm392_vm12 = vcmp.eq.s32.totalorder %v986_v22, 25 }
  0x94   : > { %v306_v43 = vstv %s305_s22  ;;  %s317_s19 = smul.f32 0.125, %s316_s7  ;;  %s1038_s27 = sld [smem:[#allocation3 + %s339_s3]] }
  0x95   : > { %v307_v44 = vsel %vm302_vm13, %v306_v43, %v301_v42  ;;  %v312_v45 = vstv %s311_s18  ;;  %s345_s29 = sadd.s32 17, %s980_s17  ;;  %s351_s30 = sadd.s32 18, %s980_s17  ;;  %vm398_vm13 = vcmp.eq.s32.totalorder %v986_v22, 26 }
  0x96   : > { %v313_v46 = vsel %vm308_vm14, %v312_v45, %v307_v44  ;;  %v318_v47 = vstv %s317_s19  ;;  %s323_s23 = smul.f32 0.125, %s1026_s6  ;;  %s1044_s25 = sld [smem:[#allocation3 + %s345_s29]]  ;;  %vm404_vm14 = vcmp.eq.s32.totalorder %v986_v22, 27 }
  0x97   : > { %v319_v48 = vsel %vm314_vm15, %v318_v47, %v313_v46  ;;  %s329_s7 = smul.f32 0.125, %s1028_s21  ;;  %s1048_s28 = sld [smem:[#allocation3 + %s351_s30]]  ;;  %vm410_vm15 = vcmp.eq.s32.totalorder %v986_v22, 28 }
  0x98   : > { %v324_v49 = vstv %s323_s23  ;;  %s335_s12 = smul.f32 0.125, %s1032_s4  ;;  %s357_s22 = sadd.s32 19, %s980_s17 }
  0x99   : > { %v325_v50 = vsel %vm320_vm0, %v324_v49, %v319_v48  ;;  %v330_v51 = vstv %s329_s7  ;;  %s1053_s6 = sld [smem:[#allocation3 + %s357_s22]]  ;;  %s363_s18 = sadd.s32 20, %s980_s17  ;;  %vm416_vm0 = vcmp.eq.s32.totalorder %v986_v22, 29 }
  0x9a   : > { %v331_v52 = vsel %vm326_vm1, %v330_v51, %v325_v50  ;;  %v336_v53 = vstv %s335_s12  ;;  %s341_s21 = smul.f32 0.125, %s1038_s27  ;;  %s364_s3 = sld [smem:[#allocation3 + %s363_s18]]  ;;  %vm422_vm1 = vcmp.eq.s32.totalorder %v986_v22, 30 }
  0x9b   : > { %v337_v54 = vsel %vm332_vm2, %v336_v53, %v331_v52  ;;  %s369_s19 = sadd.s32 21, %s980_s17  ;;  %s375_s4 = sadd.s32 22, %s980_s17  ;;  %vm428_vm2 = vcmp.eq.s32.totalorder %v986_v22, 31 }
  0x9c   : > { %v342_v55 = vstv %s341_s21  ;;  %s347_s29 = smul.f32 0.125, %s1044_s25  ;;  %s1062_s30 = sld [smem:[#allocation3 + %s369_s19]] }
  0x9d   : > { %v343_v56 = vsel %vm338_vm3, %v342_v55, %v337_v54  ;;  %s353_s23 = smul.f32 0.125, %s1048_s28  ;;  %s1066_s7 = sld [smem:[#allocation3 + %s375_s4]] }
  0x9e   : > { %v348_v57 = vstv %s347_s29  ;;  %s381_s27 = sadd.s32 23, %s980_s17  ;;  %s387_s12 = sadd.s32 24, %s980_s17 }
  0x9f   : > { %v349_v58 = vsel %vm344_vm4, %v348_v57, %v343_v56  ;;  %v354_v59 = vstv %s353_s23  ;;  %s359_s22 = smul.f32 0.125, %s1053_s6  ;;  %s1072_s25 = sld [smem:[#allocation3 + %s381_s27]] }
  0xa0   : > { %v355_v60 = vsel %vm350_vm5, %v354_v59, %v349_v58  ;;  %s365_s28 = smul.f32 0.125, %s364_s3  ;;  %s1075_s18 = sld [smem:[#allocation3 + %s387_s12]] }
  0xa1   : > { %v360_v61 = vstv %s359_s22  ;;  %s393_s21 = sadd.s32 25, %s980_s17  ;;  %s399_s19 = sadd.s32 26, %s980_s17 }
  0xa2   : > { %v361_v62 = vsel %vm356_vm6, %v360_v61, %v355_v60  ;;  %v366_v63 = vstv %s365_s28  ;;  %s371_s6 = smul.f32 0.125, %s1062_s30  ;;  %s1081_s4 = sld [smem:[#allocation3 + %s393_s21]] }
  0xa3   : > { %v367_v0 = vsel %vm362_vm7, %v366_v63, %v361_v62  ;;  %s377_s3 = smul.f32 0.125, %s1066_s7  ;;  %s400_s29 = sld [smem:[#allocation3 + %s399_s19]] }
  0xa4   : > { %v372_v1 = vstv %s371_s6  ;;  %s405_s23 = sadd.s32 27, %s980_s17  ;;  %s411_s27 = sadd.s32 28, %s980_s17 }
  0xa5   : > { %v373_v2 = vsel %vm368_vm8, %v372_v1, %v367_v0  ;;  %v378_v3 = vstv %s377_s3  ;;  %s383_s12 = smul.f32 0.125, %s1072_s25  ;;  %s406_s30 = sld [smem:[#allocation3 + %s405_s23]] }
  0xa6   : > { %v379_v4 = vsel %vm374_vm9, %v378_v3, %v373_v2  ;;  %s389_s22 = smul.f32 0.125, %s1075_s18  ;;  %s412_s28 = sld [smem:[#allocation3 + %s411_s27]] }
  0xa7   : > { %v384_v5 = vstv %s383_s12  ;;  %s417_s7 = sadd.s32 29, %s980_s17  ;;  %s423_s21 = sadd.s32 30, %s980_s17 }
  0xa8   : > { %v385_v6 = vsel %vm380_vm10, %v384_v5, %v379_v4  ;;  %v390_v7 = vstv %s389_s22  ;;  %s395_s19 = smul.f32 0.125, %s1081_s4  ;;  %s418_s6 = sld [smem:[#allocation3 + %s417_s7]] }
  0xa9   : > { %v391_v8 = vsel %vm386_vm11, %v390_v7, %v385_v6  ;;  %s401_s25 = smul.f32 0.125, %s400_s29  ;;  %s424_s3 = sld [smem:[#allocation3 + %s423_s21]] }
  0xaa   : > { %v396_v9 = vstv %s395_s19  ;;  %s429_s23 = sadd.s32 31, %s980_s17  ;;  %s455_s22 = sshll.u32 %s976_s24, 4  ;;  %s1111_s22 = int_to_ptr.vmem [resolvable:$true] %s455_s22 }
  0xab   : > { %v397_v10 = vsel %vm392_vm12, %v396_v9, %v391_v8  ;;  %v402_v11 = vstv %s401_s25  ;;  %s407_s18 = smul.f32 0.125, %s406_s30  ;;  %s430_s27 = sld [smem:[#allocation3 + %s429_s23]] }
  0xac   : > { %v403_v12 = vsel %vm398_vm13, %v402_v11, %v397_v10  ;;  %s413_s12 = smul.f32 0.125, %s412_s28  ;;  %s1109_s21 = scalar_lea.hbm %s1163_s2, %s980_s17 }
  0xad   : > { %v408_v13 = vstv %s407_s18  ;;  %s441_s19 = scalar_lea.sflag [#allocation5], %s966_s8  ;;  %s796_s16 = smov [#allocation8]  }
  0xae   : > { %v409_v14 = vsel %vm404_vm14, %v408_v13, %v403_v12  ;;  %v414_v15 = vstv %s413_s12  ;;  %s419_s4 = smul.f32 0.125, %s418_s6  ;;  %s702_s6 = scalar_lea.vmem %s1111_s22, 256 }
  0xaf   : > { %v415_v16 = vsel %vm410_vm15, %v414_v15, %v409_v14  ;;  %s425_s29 = smul.f32 0.125, %s424_s3  ;;  %p703_p8 = scmp.ne.s32.totalorder %s1111_s22, %s702_s6 }
  0xb0   : > { %v420_v17 = vstv %s419_s4  ;;  %s706_s25 = sshll.u32 %s796_s16, 4  ;;  %s707_s25 = int_to_ptr.vmem [resolvable:$false] %s706_s25 }
  0xb1   : > { %v421_v18 = vsel %vm416_vm0, %v420_v17, %v415_v16  ;;  %v426_v19 = vstv %s425_s29  ;;  %s431_s30 = smul.f32 0.125, %s430_s27  ;;  %p704_p5 = pnand %p703_p8, %p1179_p2 }
  0xb2   : > { %v427_v20 = vsel %vm422_vm1, %v426_v19, %v421_v18  ;;  %s708_s17 = scalar_lea.vmem %s707_s25, 512  ;;  %p709_p0 = scmp.lt.s32.totalorder %s1111_s22, %s707_s25 }
  0xb3   : > { %v432_v24 = vstv %s431_s30  ;;  %p705_p6 = pneg %p704_p5  ;;  %p710_p10 = scmp.lt.s32.totalorder %s708_s17, %s702_s6 }
  0xb4   : > { %v433_v25 = vsel %vm428_vm2, %v432_v24, %v427_v20 }
  0xb5   : > { %v436_v26 = vadd.f32 %v434_v21, %v433_v25  ;;  %v437_v22 = vadd.f32 %v435_v23, %v433_v25  ;;  %p711_p3 = por %p710_p10, %p709_p0 }
  0xb7   : > { %438 = vst [vmem:[%s976_s24] sm:$0xff] %v436_v26  ;;  %439 = vst [vmem:[%s976_s24 + $0x8] sm:$0xff] %v437_v22  ;;  %p712_p7 = pnand %p711_p3, %p705_p6 }
  0xb9   : > { %715 = shalt.err (!%p712_p7)
}
  0xba   : > { %s716_s24 = scalar_lea.hbm %s1109_s21, 256  ;;  %s720_s18 = scalar_lea.hbm %s1163_s2, 3072 }
  0xbb   : > { %p717_p9 = scmp.ne.s32.totalorder %s1109_s21, %s716_s24  ;;  %p721_p13 = scmp.lt.u32.totalorder %s1109_s21, %s1163_s2 }
  0xbc   : > { %p722_p1 = scmp.lt.u32.totalorder %s720_s18, %s716_s24  ;;  %p724_p8 = scmp.lt.u32.totalorder %s716_s24, %s1109_s21 }
  0xbd   : > { %p718_p11 = pnand %p717_p9, %p1179_p2 }
  0xbe   : > { %p723_p4 = por %p722_p1, %p721_p13 }
  0xbf   : > { %p719_p12 = pneg %p718_p11 }
  0xc0   : > { %p725_p5 = por %p724_p8, %p723_p4 }
  0xc2   : > { %p726_p6 = pnand %p725_p5, %p719_p12 }
  0xc4   : > { %729 = shalt.err (!%p726_p6)
}
  0xc5   : > { %s797_s4 = smov 128   ;;  %s798_s29 = smov 1536  }
  0xc6   : > { %s799_s30 = smov 8  }
  0xc7   : > { %581 = dma.vmem_to_hbm [thread:$0]  (%p1179_p2), %s1111_s22, 256, %s1109_s21, %s441_s19, %s797_s4, %s798_s29, %s799_s30  }
  0xc8 PF: > { %p598_p0 = scmp.ge.s32.totalorder %s788_s14, 2  ;;  %s470_s28 = sand.u32 1, %s768_s9  }
  0xc9   : > { %p1180_p10 = scmp.ne.s32.totalorder %s1171_s20, 0  ;;  %s471_s7 = scalar_lea.sflag [#allocation5], %s470_s28 }
  0xcb   : > { %p592_p3 = pnand %p598_p0, %p1180_p10 }
  0xcd   : > { %763 = dma.done.wait (!%p592_p3), %s471_s7, 256  }
  0xce   : > { %765 = vsyncadd (!%p592_p3), %s471_s7, 4294967040  ;;  %s19_s14 = sadd.s32 1, %s788_s14   ;;  %s1181_s9 = smov %s772_s10 }
  0xcf   : > { %p16_p7 = scmp.ge.s32.totalorder %s19_s14, 14   ;;  %s1182_s10 = smov %s776_s11 }
  0xd0   : > { %s1183_s11 = smov %s913_s15  ;;  %s1184_s12 = smov %s784_s13 }
  0xd1   : > { %s1185_s13 = smov %s1187_s26  ;;  %18 = sbr.rel (!%p16_p7) target bundleno = 7 (0x7), region = 82 }
  0xd8   :  { %476 = vsyncpa [#allocation4], 1 }
  0xd9   :  { %478 = vsyncpa [#allocation4 + $0x1], 1 }
  0xda   :  { %479 = vsyncpa [#allocation5], 1 }
  0xdb   :  { %481 = vsyncpa [#allocation5 + $0x1], 1 }
  0xdc   :  { %482 = vsyncpa [#allocation6], 1 }
  0xdd   :  { %484 = vsyncpa [#allocation6 + $0x1], 1 }

</bundles_post_ra>
